<compile_context>
chip_gen: v5e
topology: v5e:2x2
jax: 0.10.0
libtpu: 0.0.40
codegen_flags: <defaults>
</compile_context>

<pallas_src>
import jax
import jax.numpy as jnp
from jax.experimental import pallas as pl
from jax.experimental.pallas import tpu as pltpu

DATA_NCLASS = {
    'mnist': 10, 'cifar10': 10, 'svhn': 10, 'fmnist': 10, 'celeba': 2,
    'cifar100': 100, 'tinyimagenet': 200, 'femnist': 26, 'emnist': 47,
    'xray': 2,
}

_LANE = 128
_SUBLANE = 8


def _round_up(x, m):
    return ((x + m - 1) // m) * m


def _vmem_capacity_bytes():
    """Per-TensorCore VMEM capacity; falls back to 128 MiB if unqueryable."""
    try:
        return int(pltpu.get_tpu_info().vmem_capacity_bytes)
    except Exception:
        return 128 * 1024 * 1024


def _make_kernel(num_valid_classes):
    def kernel(feat_ref, labels_ref, center_ref, neg_ref):
        # feat_ref   : (tm, D)    native dtype (f32 or bf16)
        # labels_ref : (tm, 1)    int32
        # center_ref : (D, Cpad)  pre-normalized, class-padded, feature dtype
        # neg_ref    : (tm, 1)    f32
        dots = jnp.dot(feat_ref[...], center_ref[...],
                       preferred_element_type=jnp.float32)       # (tm, Cpad) f32
        labels = labels_ref[...]                                 # (tm, 1)
        class_ids = jax.lax.broadcasted_iota(jnp.int32, dots.shape, 1)
        # Mask out the sample's own class AND the zero-padded pad classes
        # (pad columns dot to 0.0, which could otherwise win the max).
        invalid = (class_ids == labels) | (class_ids >= num_valid_classes)
        masked = jnp.where(invalid, -jnp.inf, dots)
        neg_ref[...] = jnp.max(masked, axis=1, keepdims=True)    # (tm, 1)
    return kernel


def _pick_block_b(B, D, Cpad, feat_bytes, vmem_cap, feat_buffers=2,
                  center_buffers=1):
    """Largest batch tile (multiple of 8) whose resident VMEM footprint fits a
    generation-aware budget, accounting for everything the pipeline
    co-allocates (not just the feature double-buffer)."""
    if B <= _SUBLANE:
        return B

    if vmem_cap <= 64 * 1024 * 1024:         # v7x: 64 MiB per TensorCore
        budget = 44 * 1024 * 1024
    else:                                    # v5e / v6e: 128 MiB physical
        budget = 64 * 1024 * 1024
    headroom = 2 * 1024 * 1024               # Mosaic internal scratch, slack

    fixed = center_buffers * D * Cpad * feat_bytes + headroom
    per_row = (
        feat_buffers * D * feat_bytes        # feature pipeline buffers
        + 2 * _LANE * 4                      # int32 labels tile, lane-padded, 2 bufs
        + 2 * _LANE * 4                      # f32 neg output tile, lane-padded, 2 bufs
        + 2 * Cpad * 4                       # f32 dots + masked intermediates
    )
    tm = (budget - fixed) // max(per_row, 1)
    tm = max(_SUBLANE, min(tm, B))
    tm = (tm // _SUBLANE) * _SUBLANE

    # Guarantee >= 2 grid steps on reasonably sized batches so the "parallel"
    # axis shards across both v7x TensorCores (costs ~one extra grid step on
    # single-TC chips, which is negligible).
    if tm >= B and B >= 2 * _SUBLANE:
        tm = _round_up(pl.cdiv(B, 2), _SUBLANE)
    return tm


def neg_loss_new(features, labels, center_list, dataset='cifar10', block_b=None):
    """features: (B, D), labels: (B,) int, center_list: list of C (D,) vectors."""
    C = DATA_NCLASS[dataset]
    B, D = features.shape
    feat_dtype = features.dtype
    feat_bytes = jnp.dtype(feat_dtype).itemsize

    # Glue (once per call, tiny): stack class centers -> (D, C), L2-normalize
    # along dim 0 in f32 (eps matches torch F.normalize default), pad classes
    # to a lane-aligned count, then cast to the feature dtype for the MXU.
    center = jnp.stack(center_list, axis=1).astype(jnp.float32)
    assert center.shape == (D, C)
    norm = jnp.sqrt(jnp.sum(center * center, axis=0, keepdims=True))   # (1, C)
    center_n = center / jnp.maximum(norm, 1e-12)
    Cpad = _round_up(C, _LANE)
    if Cpad != C:
        center_n = jnp.pad(center_n, ((0, 0), (0, Cpad - C)))
    center_n = center_n.astype(feat_dtype)

    labels2d = labels.astype(jnp.int32).reshape(B, 1)

    vmem_cap = _vmem_capacity_bytes()
    if block_b is None:
        block_b = _pick_block_b(B, D, Cpad, feat_bytes, vmem_cap)
    num_tiles = pl.cdiv(B, block_b)

    # Deep (3-buffer) feature pipeline only when tiles are small and the grid
    # is long enough for the extra prefetch depth to matter.
    feat_tile_bytes = block_b * D * feat_bytes
    deep_pipeline = (num_tiles >= 8) and (feat_tile_bytes < (1 << 20))

    # Explicit VMEM limit matched to what we actually allocate (+ headroom),
    # instead of relying on the 16/32 MiB scoped defaults.
    resident = (
        (3 if deep_pipeline else 2) * feat_tile_bytes     # feature buffers
        + D * Cpad * feat_bytes                           # resident center
        + 2 * block_b * _LANE * 4                         # labels tile (padded)
        + 2 * block_b * _LANE * 4                         # neg output tile (padded)
        + 2 * block_b * Cpad * 4                          # f32 intermediates
    )
    vmem_limit = int(min(vmem_cap, max(resident + (8 << 20), 32 << 20)))

    cost = pl.CostEstimate(
        flops=2 * B * D * Cpad,
        transcendentals=0,
        bytes_accessed=(B * D * feat_bytes + D * Cpad * feat_bytes
                        + B * 4 + B * 4),
    )

    kernel = _make_kernel(C)
    out_shape = jax.ShapeDtypeStruct((B, 1), jnp.float32)

    def _call(use_pipeline_mode):
        feat_kwargs = {}
        center_kwargs = {}
        if use_pipeline_mode:
            # Center block index never changes -> a second buffer is pure waste.
            center_kwargs = dict(pipeline_mode=pl.Buffered(1))
            if deep_pipeline:
                feat_kwargs = dict(pipeline_mode=pl.Buffered(3))
        return pl.pallas_call(
            kernel,
            out_shape=out_shape,
            grid=(num_tiles,),
            in_specs=[
                pl.BlockSpec((block_b, D), lambda i: (i, 0), **feat_kwargs),
                pl.BlockSpec((block_b, 1), lambda i: (i, 0)),
                pl.BlockSpec((D, Cpad), lambda i: (0, 0), **center_kwargs),
            ],
            out_specs=pl.BlockSpec((block_b, 1), lambda i: (i, 0)),
            compiler_params=pltpu.CompilerParams(
                dimension_semantics=("parallel",),
                vmem_limit_bytes=vmem_limit,
            ),
            cost_estimate=cost,
        )(features, labels2d, center_n)

    try:
        neg = _call(True)
    except Exception:
        # Fallback if this JAX build rejects pipeline_mode on BlockSpec.
        neg = _call(False)

    # Constant ones column is free in XLA; keeps kernel writeback to 4 B/row.
    return jnp.concatenate([neg, jnp.ones_like(neg)], axis=1)


def _reference(features, labels, center_list):
    center = jnp.stack(center_list, axis=1).astype(jnp.float32)        # (D, C)
    norm = jnp.sqrt(jnp.sum(center * center, axis=0, keepdims=True))
    center_n = center / jnp.maximum(norm, 1e-12)
    dots = features.astype(jnp.float32) @ center_n                     # (B, C)
    B, C = dots.shape
    class_ids = jnp.arange(C)[None, :]
    masked = jnp.where(class_ids == labels[:, None], -jnp.inf, dots)
    neg = jnp.max(masked, axis=1, keepdims=True)
    return jnp.concatenate([neg, jnp.ones_like(neg)], axis=1)


if __name__ == "__main__":
    key = jax.random.PRNGKey(0)
    k_feat, k_lab, k_cent = jax.random.split(key, 3)

    B, D = 8, 32
    dataset = 'cifar10'
    C = DATA_NCLASS[dataset]

    features = jax.random.normal(k_feat, (B, D), dtype=jnp.float32)
    labels = jax.random.randint(k_lab, (B,), 0, C, dtype=jnp.int32)
    # "center" is a list of per-class center vectors (deterministic init).
    center_mat = jax.random.normal(k_cent, (D, C), dtype=jnp.float32)
    center_list = [center_mat[:, c] for c in range(C)]

    logits = neg_loss_new(features, labels, center_list, dataset=dataset)
    logits = jax.block_until_ready(logits)

    ref = _reference(features, labels, center_list)
    assert logits.shape == (B, 2)
    assert jnp.allclose(logits, ref, atol=1e-5, rtol=1e-5), (logits, ref)

    print("KERNEL_OK")
</pallas_src>

<mosaic_0001>
module attributes {stable_mosaic.version = 11 : i64} {
  func.func @kernel(%arg0: i32, %arg1: memref<8x32xf32, #tpu.memory_space<vmem>>, %arg2: memref<8x1xi32, #tpu.memory_space<vmem>>, %arg3: memref<32x128xf32, #tpu.memory_space<vmem>>, %arg4: memref<8x1xf32, #tpu.memory_space<vmem>>) attributes {dimension_semantics = [#tpu.dimension_semantics<parallel>], iteration_bounds = array<i64: 1>, scalar_prefetch = 0 : i64, scratch_operands = 0 : i64, tpu.core_type = #tpu.core_type<tc>, window_params = [{transform_indices = @transform_0, window_bounds = array<i64: 8, 32>}, {transform_indices = @transform_1, window_bounds = array<i64: 8, 1>}, {pipeline_mode = #tpu.pipeline_mode<synchronous>, transform_indices = @transform_2, window_bounds = array<i64: 32, 128>}, {transform_indices = @transform_3, window_bounds = array<i64: 8, 1>}]} {
    %c0 = arith.constant 0 : index
    %c0_0 = arith.constant 0 : index
    %0 = vector.load %arg1[%c0, %c0_0] : memref<8x32xf32, #tpu.memory_space<vmem>>, vector<8x32xf32>
    %c0_1 = arith.constant 0 : index
    %c0_2 = arith.constant 0 : index
    %1 = vector.load %arg3[%c0_1, %c0_2] : memref<32x128xf32, #tpu.memory_space<vmem>>, vector<32x128xf32>
    %cst = arith.constant dense<0.000000e+00> : vector<8x128xf32>
    %2 = tpu.matmul %0, %1, %cst {dimension_numbers = #tpu.dot_dimension_numbers<[1], [0], [0], [1], [0, 0, 1, 1], [], []>} : vector<8x32xf32>, vector<32x128xf32>, vector<8x128xf32> -> vector<8x128xf32>
    %c0_3 = arith.constant 0 : index
    %c0_4 = arith.constant 0 : index
    %3 = vector.load %arg2[%c0_3, %c0_4] : memref<8x1xi32, #tpu.memory_space<vmem>>, vector<8x1xi32>
    %4 = tpu.iota {dimensions = array<i32: 1>} : vector<8x128xi32>
    %5 = vector.broadcast %3 : vector<8x1xi32> to vector<8x128xi32>
    %6 = arith.cmpi eq, %4, %5 : vector<8x128xi32>
    %c10_i32 = arith.constant 10 : i32
    %7 = vector.broadcast %c10_i32 : i32 to vector<8x128xi32>
    %8 = arith.cmpi sge, %4, %7 : vector<8x128xi32>
    %9 = arith.ori %6, %8 : vector<8x128xi1>
    %cst_5 = arith.constant 0xFF800000 : f32
    %10 = vector.broadcast %cst_5 : f32 to vector<8x128xf32>
    %11 = arith.select %9, %10, %2 : vector<8x128xi1>, vector<8x128xf32>
    %cst_6 = arith.constant dense<0xFF800000> : vector<8xf32>
    %12 = vector.multi_reduction <maximumf>, %11, %cst_6 [1] : vector<8x128xf32> to vector<8xf32>
    %13 = vector.shape_cast %12 : vector<8xf32> to vector<8x1xf32>
    %c0_7 = arith.constant 0 : index
    %c0_8 = arith.constant 0 : index
    %14 = vector.load %arg4[%c0_7, %c0_8] : memref<8x1xf32, #tpu.memory_space<vmem>>, vector<8x1xf32>
    tpu.vector_store %arg4[%c0_7, %c0_8], %13 {strides = array<i32>} : memref<8x1xf32, #tpu.memory_space<vmem>>, vector<8x1xf32>,
    return
  }
  func.func @transform_0(%arg0: i32) -> (i32, i32) {
    %c0_i32 = arith.constant 0 : i32
    %c0_i32_0 = arith.constant 0 : i32
    return %arg0, %c0_i32 : i32, i32
  }
  func.func @transform_1(%arg0: i32) -> (i32, i32) {
    %c0_i32 = arith.constant 0 : i32
    %c0_i32_0 = arith.constant 0 : i32
    return %arg0, %c0_i32 : i32, i32
  }
  func.func @transform_2(%arg0: i32) -> (i32, i32) {
    %c0_i32 = arith.constant 0 : i32
    %c0_i32_0 = arith.constant 0 : i32
    %c0_i32_1 = arith.constant 0 : i32
    return %c0_i32, %c0_i32_0 : i32, i32
  }
  func.func @transform_3(%arg0: i32) -> (i32, i32) {
    %c0_i32 = arith.constant 0 : i32
    %c0_i32_0 = arith.constant 0 : i32
    return %arg0, %c0_i32 : i32, i32
  }
}

module attributes {stable_mosaic.version = 11 : i64} {
  func.func @kernel(%arg0: i32, %arg1: memref<8x32xf32, #tpu.memory_space<vmem>>, %arg2: memref<8x1xi32, #tpu.memory_space<vmem>>, %arg3: memref<32x128xf32, #tpu.memory_space<vmem>>, %arg4: memref<8x1xf32, #tpu.memory_space<vmem>>) attributes {dimension_semantics = [#tpu.dimension_semantics<parallel>], iteration_bounds = array<i64: 1>, scalar_prefetch = 0 : i64, scratch_operands = 0 : i64, tpu.core_type = #tpu.core_type<tc>, window_params = [{transform_indices = @transform_0, window_bounds = array<i64: 8, 32>}, {transform_indices = @transform_1, window_bounds = array<i64: 8, 1>}, {pipeline_mode = #tpu.pipeline_mode<synchronous>, transform_indices = @transform_2, window_bounds = array<i64: 32, 128>}, {transform_indices = @transform_3, window_bounds = array<i64: 8, 1>}]} {
    %c0 = arith.constant 0 : index
    %c0_0 = arith.constant 0 : index
    %0 = vector.load %arg1[%c0, %c0_0] : memref<8x32xf32, #tpu.memory_space<vmem>>, vector<8x32xf32>
    %c0_1 = arith.constant 0 : index
    %c0_2 = arith.constant 0 : index
    %1 = vector.load %arg3[%c0_1, %c0_2] : memref<32x128xf32, #tpu.memory_space<vmem>>, vector<32x128xf32>
    %cst = arith.constant dense<0.000000e+00> : vector<8x128xf32>
    %2 = tpu.matmul %0, %1, %cst {dimension_numbers = #tpu.dot_dimension_numbers<[1], [0], [0], [1], [0, 0, 1, 1], [], []>} : vector<8x32xf32>, vector<32x128xf32>, vector<8x128xf32> -> vector<8x128xf32>
    %c0_3 = arith.constant 0 : index
    %c0_4 = arith.constant 0 : index
    %3 = vector.load %arg2[%c0_3, %c0_4] : memref<8x1xi32, #tpu.memory_space<vmem>>, vector<8x1xi32>
    %4 = tpu.iota {dimensions = array<i32: 1>} : vector<8x128xi32>
    %5 = vector.broadcast %3 : vector<8x1xi32> to vector<8x128xi32>
    %6 = arith.cmpi eq, %4, %5 : vector<8x128xi32>
    %c10_i32 = arith.constant 10 : i32
    %7 = vector.broadcast %c10_i32 : i32 to vector<8x128xi32>
    %8 = arith.cmpi sge, %4, %7 : vector<8x128xi32>
    %9 = arith.ori %6, %8 : vector<8x128xi1>
    %cst_5 = arith.constant 0xFF800000 : f32
    %10 = vector.broadcast %cst_5 : f32 to vector<8x128xf32>
    %11 = arith.select %9, %10, %2 : vector<8x128xi1>, vector<8x128xf32>
    %cst_6 = arith.constant dense<0xFF800000> : vector<8xf32>
    %12 = vector.multi_reduction <maximumf>, %11, %cst_6 [1] : vector<8x128xf32> to vector<8xf32>
    %13 = vector.shape_cast %12 : vector<8xf32> to vector<8x1xf32>
    %c0_7 = arith.constant 0 : index
    %c0_8 = arith.constant 0 : index
    %14 = vector.load %arg4[%c0_7, %c0_8] : memref<8x1xf32, #tpu.memory_space<vmem>>, vector<8x1xf32>
    tpu.vector_store %arg4[%c0_7, %c0_8], %13 {strides = array<i32>} : memref<8x1xf32, #tpu.memory_space<vmem>>, vector<8x1xf32>,
    return
  }
  func.func @transform_0(%arg0: i32) -> (i32, i32) {
    %c0_i32 = arith.constant 0 : i32
    %c0_i32_0 = arith.constant 0 : i32
    return %arg0, %c0_i32 : i32, i32
  }
  func.func @transform_1(%arg0: i32) -> (i32, i32) {
    %c0_i32 = arith.constant 0 : i32
    %c0_i32_0 = arith.constant 0 : i32
    return %arg0, %c0_i32 : i32, i32
  }
  func.func @transform_2(%arg0: i32) -> (i32, i32) {
    %c0_i32 = arith.constant 0 : i32
    %c0_i32_0 = arith.constant 0 : i32
    %c0_i32_1 = arith.constant 0 : i32
    return %c0_i32, %c0_i32_0 : i32, i32
  }
  func.func @transform_3(%arg0: i32) -> (i32, i32) {
    %c0_i32 = arith.constant 0 : i32
    %c0_i32_0 = arith.constant 0 : i32
    return %arg0, %c0_i32 : i32, i32
  }
}

</mosaic_0001>

<bundles_post_ra>
// kernel: tpu_custom_call.1
= control target key start
LH: loop header
LB: loop body
LE: loop exit
PB: predicated region body
PF: predicated region fallthrough
CT: control target
= control target key end

     0   :  { %8 = vsyncpa [#allocation3], 0  ;;  %s110_s15 = smov [#allocation2]   ;;  %s111_s17 = smov 128   ;;  %s146_s0 = inlined_call_operand.vmem [shape: f32[8,32], index: 0, kind: input, shape index: {}]   ;;  %s147_s1 = inlined_call_operand.vmem [shape: s32[8,1], index: 1, kind: input, shape index: {}]   ;;  %s148_s2 = inlined_call_operand.hbm [shape: f32[32,128], index: 2, kind: input, shape index: {}]   ;;  %s149_s3 = inlined_call_operand.vmem [shape: f32[8,1], index: 3, kind: output, shape index: {}]  }
   0x1   :  { %s17_s14 = sshll.u32 %s148_s2, 4  ;;  %s19_s16 = sshll.u32 %s110_s15, 4  ;;  %s18_s14 = int_to_ptr.hbm [resolvable:$true] %s17_s14  ;;  %s20_s16 = int_to_ptr.vmem [resolvable:$true] %s19_s16 }
   0x2   :  { %s112_s18 = smov 8  }
   0x3   :  { %25 = dma.hbm_to_vmem [thread:$0]  %s18_s14, 512, %s20_s16, [#allocation3], %s111_s17, %s111_s17, %s112_s18  }
   0x4   :  { %108 = dma.done.wait [#allocation3], 512  }
   0x5   :  { %109 = vsyncadd [#allocation3], 4294966784  ;;  %v113_v0 = vmov 0   ;;  %v34_v1 = vld [vmem:[#allocation2 + $0x18] sm:$0xff]  ;;  %v33_v2 = vld [vmem:[#allocation2 + $0x10] sm:$0xff]  ;;  %vm35_vm0 = vcmask 261120   ;;  %v60_v7 = vlaneseq }
   0x6   :  { %83 = vset.pattern.permute.xlu0 %v113_v0  ;;  %51 = vmatpush.msra.mxu0 %v34_v1  ;;  %v59_v3 = vld [vmem:[%s147_s1] sm:$0xff]  ;;  %v32_v4 = vld [vmem:[#allocation2 + $0x8] sm:$0xff]  ;;  %vm71_vm4 = vcmask 7168  }
   0x7   :  { %63 = vperm.xlu0 %83, %v59_v3   ;;  %v31_v5 = vld [vmem:[#allocation2] sm:$0xff]  ;;  %v61_v8 = vand.u32 127, %v60_v7 }
   0x8   :  { %52 = vmatpush.msra.mxu0 %v33_v2  ;;  %v30_v6 = vld [vmem:[%s146_s0] sm:$0xff] }
   0x9   :  { %vm66_vm2 = vcmp.ge.s32.totalorder %v61_v8, 10 }
   0xa   :  { %53 = vmatpush.msra.mxu0 %v32_v4 }
   0xc   :  { %54 = vmatpush.msra.mxu0 %v31_v5 }
   0xd   :  { %78 = vmatmul.msk.f32.vlgmr.msra.gmra.mxu0 %vm35_vm0, %v30_v6 }
  0x79   :  { %v64_v9 = vpop.permute.xlu0 %63 }
  0x7a   :  { %vm65_vm1 = vcmp.eq.s32.totalorder %v61_v8, %v64_v9 }
  0x7b   :  { %vm67_vm3 = vmor %vm65_vm1, %vm66_vm2 }
  0x8a   :  { %v56_v10 = vpop.f32.mrf.mxu0 }
  0x8b   :  { %v68_v11 = vsel %vm67_vm3, -inf, %v56_v10 }
  0x8c   :  { %69 = vmax.xlane.f32.xlu0 %v68_v11 }
  0xff   :  { %v70_v12 = vpop.xlane.xlu0 %69 }
 0x100   :  { %72 = vst.msk [vmem:[%s149_s3] sm:$0xff] %vm71_vm4, %v70_v12 }
 0x101   :  { %77 = vsyncpa [#allocation3], 1 }

// kernel: tpu_custom_call.1
= control target key start
LH: loop header
LB: loop body
LE: loop exit
PB: predicated region body
PF: predicated region fallthrough
CT: control target
= control target key end

     0   :  { %8 = vsyncpa [#allocation3], 0  ;;  %s110_s15 = smov [#allocation2]   ;;  %s111_s17 = smov 128   ;;  %s146_s0 = inlined_call_operand.vmem [shape: f32[8,32], index: 0, kind: input, shape index: {}]   ;;  %s147_s1 = inlined_call_operand.vmem [shape: s32[8,1], index: 1, kind: input, shape index: {}]   ;;  %s148_s2 = inlined_call_operand.hbm [shape: f32[32,128], index: 2, kind: input, shape index: {}]   ;;  %s149_s3 = inlined_call_operand.vmem [shape: f32[8,1], index: 3, kind: output, shape index: {}]  }
   0x1   :  { %s17_s14 = sshll.u32 %s148_s2, 4  ;;  %s19_s16 = sshll.u32 %s110_s15, 4  ;;  %s18_s14 = int_to_ptr.hbm [resolvable:$true] %s17_s14  ;;  %s20_s16 = int_to_ptr.vmem [resolvable:$true] %s19_s16 }
   0x2   :  { %s112_s18 = smov 8  }
   0x3   :  { %25 = dma.hbm_to_vmem [thread:$0]  %s18_s14, 512, %s20_s16, [#allocation3], %s111_s17, %s111_s17, %s112_s18  }
   0x4   :  { %108 = dma.done.wait [#allocation3], 512  }
   0x5   :  { %109 = vsyncadd [#allocation3], 4294966784  ;;  %v113_v0 = vmov 0   ;;  %v34_v1 = vld [vmem:[#allocation2 + $0x18] sm:$0xff]  ;;  %v33_v2 = vld [vmem:[#allocation2 + $0x10] sm:$0xff]  ;;  %vm35_vm0 = vcmask 261120   ;;  %v60_v7 = vlaneseq }
   0x6   :  { %83 = vset.pattern.permute.xlu0 %v113_v0  ;;  %51 = vmatpush.msra.mxu0 %v34_v1  ;;  %v59_v3 = vld [vmem:[%s147_s1] sm:$0xff]  ;;  %v32_v4 = vld [vmem:[#allocation2 + $0x8] sm:$0xff]  ;;  %vm71_vm4 = vcmask 7168  }
   0x7   :  { %63 = vperm.xlu0 %83, %v59_v3   ;;  %v31_v5 = vld [vmem:[#allocation2] sm:$0xff]  ;;  %v61_v8 = vand.u32 127, %v60_v7 }
   0x8   :  { %52 = vmatpush.msra.mxu0 %v33_v2  ;;  %v30_v6 = vld [vmem:[%s146_s0] sm:$0xff] }
   0x9   :  { %vm66_vm2 = vcmp.ge.s32.totalorder %v61_v8, 10 }
   0xa   :  { %53 = vmatpush.msra.mxu0 %v32_v4 }
   0xc   :  { %54 = vmatpush.msra.mxu0 %v31_v5 }
   0xd   :  { %78 = vmatmul.msk.f32.vlgmr.msra.gmra.mxu0 %vm35_vm0, %v30_v6 }
  0x79   :  { %v64_v9 = vpop.permute.xlu0 %63 }
  0x7a   :  { %vm65_vm1 = vcmp.eq.s32.totalorder %v61_v8, %v64_v9 }
  0x7b   :  { %vm67_vm3 = vmor %vm65_vm1, %vm66_vm2 }
  0x8a   :  { %v56_v10 = vpop.f32.mrf.mxu0 }
  0x8b   :  { %v68_v11 = vsel %vm67_vm3, -inf, %v56_v10 }
  0x8c   :  { %69 = vmax.xlane.f32.xlu0 %v68_v11 }
  0xff   :  { %v70_v12 = vpop.xlane.xlu0 %69 }
 0x100   :  { %72 = vst.msk [vmem:[%s149_s3] sm:$0xff] %vm71_vm4, %v70_v12 }
 0x101   :  { %77 = vsyncpa [#allocation3], 1 }

</bundles_post_ra>
